<compile_context>
chip_gen: v7x
topology: tpu7x:2x2x1
jax: 0.10.0
libtpu: 0.0.40
codegen_flags: <defaults>
</compile_context>

<pallas_src>
import functools

import jax
import jax.numpy as jnp
from jax.experimental import pallas as pl
from jax.experimental.pallas import tpu as pltpu


def _sliding_window_copy_kernel(start, window,
                                keys_hbm, values_hbm,
                                out_k_hbm, out_v_hbm, sems):
    """Single invocation: batch-strided HBM->HBM copy of the window.

    keys_hbm   : (B, S, Dk)      raw HBM ref
    values_hbm : (B, S, Dv)      raw HBM ref
    out_k_hbm  : (B, window, Dk) raw HBM ref
    out_v_hbm  : (B, window, Dv) raw HBM ref
    sems       : DMA semaphores, shape (2,)
    """
    copy_k = pltpu.make_async_copy(
        keys_hbm.at[:, pl.ds(start, window), :], out_k_hbm, sems.at[0]
    )
    copy_v = pltpu.make_async_copy(
        values_hbm.at[:, pl.ds(start, window), :], out_v_hbm, sems.at[1]
    )
    # Issue both, then wait: K and V transfers overlap on the DMA engines.
    copy_k.start()
    copy_v.start()
    copy_k.wait()
    copy_v.wait()


@functools.partial(jax.jit, static_argnames=("window_size",))
def sliding_window(keys, values, *, window_size):
    """keys: (B, S, Dk); values: (B, S, Dv) -> (keys[:, -w:], values[:, -w:])."""
    B, S, Dk = keys.shape
    Bv, Sv, Dv = values.shape
    assert (B, S) == (Bv, Sv), "keys/values must share (batch, seq)"

    # Exact Python/NumPy semantics of `x[:, -window_size:]`, including the
    # window_size == 0 ("-0" -> full sequence) and negative cases.
    start, stop, _ = slice(-int(window_size), None).indices(S)
    w = max(stop - start, 0)

    if w == 0:
        # Degenerate empty window: no bytes to move, skip the kernel entirely.
        return keys[:, S:], values[:, S:]

    kernel = functools.partial(_sliding_window_copy_kernel, start, w)
    out_k, out_v = pl.pallas_call(
        kernel,
        out_shape=(
            jax.ShapeDtypeStruct((B, w, Dk), keys.dtype),
            jax.ShapeDtypeStruct((B, w, Dv), values.dtype),
        ),
        in_specs=[
            pl.BlockSpec(memory_space=pl.ANY),   # keys stay in HBM
            pl.BlockSpec(memory_space=pl.ANY),   # values stay in HBM
        ],
        out_specs=(
            pl.BlockSpec(memory_space=pl.ANY),   # write directly to HBM
            pl.BlockSpec(memory_space=pl.ANY),
        ),
        scratch_shapes=[pltpu.SemaphoreType.DMA((2,))],
    )(keys, values)
    return out_k, out_v


def sliding_window_ref(keys, values, *, window_size):
    """Pure-JAX reference matching the PyTorch forward."""
    return keys[:, -window_size:], values[:, -window_size:]


if __name__ == "__main__":
    # Small shapes consistent with the module's forward; last dim lane-dense
    # (128) and S - window_size = 8 is sublane-aligned for f32.
    B, S, D = 2, 16, 128
    window_size = 8

    key = jax.random.PRNGKey(0)
    k_keys, k_vals = jax.random.split(key)
    keys = jax.random.normal(k_keys, (B, S, D), dtype=jnp.float32)
    values = jax.random.normal(k_vals, (B, S, D), dtype=jnp.float32)

    out_k, out_v = sliding_window(keys, values, window_size=window_size)
    out_k, out_v = jax.block_until_ready((out_k, out_v))

    ref_k, ref_v = sliding_window_ref(keys, values, window_size=window_size)
    assert out_k.shape == ref_k.shape, (out_k.shape, ref_k.shape)
    assert out_v.shape == ref_v.shape, (out_v.shape, ref_v.shape)
    assert jnp.array_equal(out_k, ref_k), float(jnp.max(jnp.abs(out_k - ref_k)))
    assert jnp.array_equal(out_v, ref_v), float(jnp.max(jnp.abs(out_v - ref_v)))
    print("KERNEL_OK")
</pallas_src>

<mosaic_0001>
module attributes {stable_mosaic.version = 11 : i64} {
  func.func @_sliding_window_copy_kernel(%arg0: memref<2x16x128xf32, #tpu.memory_space<any>>, %arg1: memref<2x16x128xf32, #tpu.memory_space<any>>, %arg2: memref<2x8x128xf32, #tpu.memory_space<any>>, %arg3: memref<2x8x128xf32, #tpu.memory_space<any>>, %arg4: memref<2x!tpu.dma_semaphore, #tpu.memory_space<semaphore_mem>>) attributes {dimension_semantics = [], scalar_prefetch = 0 : i64, scratch_operands = 1 : i64, tpu.core_type = #tpu.core_type<tc>} {
    %c0_i32 = arith.constant 0 : i32
    %c0_i32_0 = arith.constant 0 : i32
    %c8_i32 = arith.constant 8 : i32
    %c0_i32_1 = arith.constant 0 : i32
    %0 = tpu.memref_slice %arg0[%c0_i32_0, %c8_i32, %c0_i32_1] : memref<2x16x128xf32, #tpu.memory_space<any>> -> memref<2x8x128xf32, #tpu.memory_space<any>>
    %1 = tpu.memref_slice %arg4[%c0_i32] : memref<2x!tpu.dma_semaphore, #tpu.memory_space<semaphore_mem>> -> memref<1x!tpu.dma_semaphore, #tpu.memory_space<semaphore_mem>>
    %2 = tpu.memref_squeeze %1 : memref<1x!tpu.dma_semaphore, #tpu.memory_space<semaphore_mem>> -> memref<!tpu.dma_semaphore, #tpu.memory_space<semaphore_mem>>
    tpu.enqueue_dma source(%0 : memref<2x8x128xf32, #tpu.memory_space<any>>) target(%arg2 : memref<2x8x128xf32, #tpu.memory_space<any>>) target_semaphore(%2 : memref<!tpu.dma_semaphore, #tpu.memory_space<semaphore_mem>>)
    %c1_i32 = arith.constant 1 : i32
    %c0_i32_2 = arith.constant 0 : i32
    %c8_i32_3 = arith.constant 8 : i32
    %c0_i32_4 = arith.constant 0 : i32
    %3 = tpu.memref_slice %arg1[%c0_i32_2, %c8_i32_3, %c0_i32_4] : memref<2x16x128xf32, #tpu.memory_space<any>> -> memref<2x8x128xf32, #tpu.memory_space<any>>
    %4 = tpu.memref_slice %arg4[%c1_i32] : memref<2x!tpu.dma_semaphore, #tpu.memory_space<semaphore_mem>> -> memref<1x!tpu.dma_semaphore, #tpu.memory_space<semaphore_mem>>
    %5 = tpu.memref_squeeze %4 : memref<1x!tpu.dma_semaphore, #tpu.memory_space<semaphore_mem>> -> memref<!tpu.dma_semaphore, #tpu.memory_space<semaphore_mem>>
    tpu.enqueue_dma source(%3 : memref<2x8x128xf32, #tpu.memory_space<any>>) target(%arg3 : memref<2x8x128xf32, #tpu.memory_space<any>>) target_semaphore(%5 : memref<!tpu.dma_semaphore, #tpu.memory_space<semaphore_mem>>)
    %c0_i32_5 = arith.constant 0 : i32
    %c0_i32_6 = arith.constant 0 : i32
    %c8_i32_7 = arith.constant 8 : i32
    %c0_i32_8 = arith.constant 0 : i32
    %6 = tpu.memref_slice %arg0[%c0_i32_6, %c8_i32_7, %c0_i32_8] : memref<2x16x128xf32, #tpu.memory_space<any>> -> memref<2x8x128xf32, #tpu.memory_space<any>>
    %7 = tpu.memref_slice %arg4[%c0_i32_5] : memref<2x!tpu.dma_semaphore, #tpu.memory_space<semaphore_mem>> -> memref<1x!tpu.dma_semaphore, #tpu.memory_space<semaphore_mem>>
    %8 = tpu.memref_squeeze %7 : memref<1x!tpu.dma_semaphore, #tpu.memory_space<semaphore_mem>> -> memref<!tpu.dma_semaphore, #tpu.memory_space<semaphore_mem>>
    tpu.wait_dma2 semaphore(%8 : memref<!tpu.dma_semaphore, #tpu.memory_space<semaphore_mem>>) src(%6 : memref<2x8x128xf32, #tpu.memory_space<any>>) dst(%arg2 : memref<2x8x128xf32, #tpu.memory_space<any>>)
    %c1_i32_9 = arith.constant 1 : i32
    %c0_i32_10 = arith.constant 0 : i32
    %c8_i32_11 = arith.constant 8 : i32
    %c0_i32_12 = arith.constant 0 : i32
    %9 = tpu.memref_slice %arg1[%c0_i32_10, %c8_i32_11, %c0_i32_12] : memref<2x16x128xf32, #tpu.memory_space<any>> -> memref<2x8x128xf32, #tpu.memory_space<any>>
    %10 = tpu.memref_slice %arg4[%c1_i32_9] : memref<2x!tpu.dma_semaphore, #tpu.memory_space<semaphore_mem>> -> memref<1x!tpu.dma_semaphore, #tpu.memory_space<semaphore_mem>>
    %11 = tpu.memref_squeeze %10 : memref<1x!tpu.dma_semaphore, #tpu.memory_space<semaphore_mem>> -> memref<!tpu.dma_semaphore, #tpu.memory_space<semaphore_mem>>
    tpu.wait_dma2 semaphore(%11 : memref<!tpu.dma_semaphore, #tpu.memory_space<semaphore_mem>>) src(%9 : memref<2x8x128xf32, #tpu.memory_space<any>>) dst(%arg3 : memref<2x8x128xf32, #tpu.memory_space<any>>)
    return
  }
}

</mosaic_0001>

<bundles_post_ra>
// kernel: sliding_window.1
= control target key start
LH: loop header
LB: loop body
LE: loop exit
PB: predicated region body
PF: predicated region fallthrough
CT: control target
= control target key end

     0   :  { %s83_s15 = smov 256   ;;  %s84_s16 = smov 128   ;;  %s123_s0 = inlined_call_operand.hbm [shape: f32[2,16,128], index: 0, kind: input, shape index: {}]   ;;  %s124_s1 = inlined_call_operand.hbm [shape: f32[2,16,128], index: 1, kind: input, shape index: {}]   ;;  %s125_s2 = inlined_call_operand.hbm [shape: f32[2,8,128], index: 2, kind: output, shape index: {0}]   ;;  %s126_s3 = inlined_call_operand.hbm [shape: f32[2,8,128], index: 3, kind: output, shape index: {1}]  }
   0x1   :  { %s9_s14 = scalar_lea.hbm %s123_s0, 128  ;;  %22 = sst [smem:[#allocation4]] %s83_s15 }
   0x2   :  { %24 = sst [smem:[#allocation4 + $0x1]] %s84_s16  ;;  %s85_s17 = smov 8  }
   0x3   :  { %26 = sst [smem:[#allocation4 + $0x2]] %s85_s17  ;;  %s86_s18 = smov [#allocation2]  }
   0x4   :  { %s87_s19 = smov [#allocation3]   ;;  %s88_s20 = smov 0  }
   0x5   :  { %28 = dma.general %s9_s14, 256, %s125_s2, %s86_s18, %s87_s19, [#allocation4], %s88_s20, 0  }
   0x6   :  { %43 = sst [smem:[#allocation6]] %s83_s15  ;;  %s29_s25 = scalar_lea.hbm %s124_s1, 128 }
   0x7   :  { %45 = sst [smem:[#allocation6 + $0x1]] %s84_s16  ;;  %s89_s0 = smov [#allocation2 + $0x1]  }
   0x8   :  { %47 = sst [smem:[#allocation6 + $0x2]] %s85_s17  ;;  %s90_s26 = smov [#allocation5]  }
   0x9   :  { %49 = dma.general %s29_s25, 256, %s126_s3, %s89_s0, %s90_s26, [#allocation6], %s88_s20, 0  }
   0xa   :  { %79 = dma.done.wait [#allocation2], 256 }
   0xb   :  { %80 = vsyncadd [#allocation2], 4294967040 }
   0xc   :  { %81 = dma.done.wait [#allocation2 + $0x1], 256 }
   0xd   :  { %82 = vsyncadd [#allocation2 + $0x1], 4294967040 }
   0xe   :  { %56 = vsyncmov [#allocation2] }
  0x11   :  { %s57_s29 = vpop.sfrf %56 }
  0x12   :  { %p69_p0 = scmp.ne.s32.totalorder %s57_s29, 0 }
  0x14   :  { %61 = shalt.err (%p69_p0)  }
  0x15   :  { %63 = vsyncmov [#allocation2 + $0x1] }
  0x18   :  { %s64_s2 = vpop.sfrf %63 }
  0x19   :  { %p70_p1 = scmp.ne.s32.totalorder %s64_s2, 0 }
  0x1b   :  { %68 = shalt.err (%p70_p1)  }

</bundles_post_ra>
